<compile_context>
chip_gen: v5e
topology: v5e:2x2
jax: 0.10.0
libtpu: 0.0.40
codegen_flags: <defaults>
</compile_context>

<pallas_src>
import functools

import jax
import jax.numpy as jnp
from jax.experimental import pallas as pl
from jax.experimental.pallas import tpu as pltpu


def _cce_kernel(vac_ref, pos_ref, neg_ref, out_ref, *, margin):
    # Keep the multiply in the input dtype (bf16-native on v6e/v7x); accumulate
    # the row reduction in f32.
    v = vac_ref[...]
    p = pos_ref[...]
    n = neg_ref[...]

    pos_scores = jnp.sum(v * p, axis=1, keepdims=True, dtype=jnp.float32)  # (TB, 1)
    neg_scores = jnp.sum(v * n, axis=1, keepdims=True, dtype=jnp.float32)  # (TB, 1)

    loss_val = jnp.exp(neg_scores + margin) - pos_scores
    loss_val = jnp.maximum(loss_val, 1.0)      # loss_val[loss_val < 1] = 1
    out_ref[...] = jnp.log(loss_val)           # per-row log-loss


def contrastive_cross_entropy(vac_emb, pos_emb, neg_emb, prefix=None, *,
                              margin=1.0, tb=None):
    """Pallas TPU implementation of ContrastiveCrossEntropy.forward.

    Returns the scalar mean loss. `prefix` is accepted for API parity.
    # TODO(synk): wandb logging side effect not implemented (no tensor output).
    """
    assert vac_emb.shape == pos_emb.shape == neg_emb.shape
    assert vac_emb.ndim == 2, "expected (B, D) embeddings"
    B, D = vac_emb.shape
    itemsize = jnp.dtype(vac_emb.dtype).itemsize

    # Sublane packing: 8 rows for 4-byte dtypes, 16 for bf16/fp16, 32 for int8/fp8.
    row_align = max(8, 8 * (4 // max(1, itemsize)))

    if tb is None:
        # 3 inputs x 2 pipeline buffers x TB x D x itemsize  <=  ~24 MiB.
        budget_rows = max(row_align, (24 * 1024 * 1024) // (3 * 2 * D * itemsize))
        tb = min(4096, budget_rows)
    tb = max(row_align, (int(tb) // row_align) * row_align)
    if tb >= B:
        tb = B                       # single full-batch block (full-dim escape)

    num_tiles = pl.cdiv(B, tb)
    if num_tiles < 2 and B > row_align:
        # Split into >= 2 tiles so both TensorCores get work on v7x megacore.
        tb = min(row_align * pl.cdiv(pl.cdiv(B, 2), row_align), B)
        num_tiles = pl.cdiv(B, tb)

    kernel = functools.partial(_cce_kernel, margin=float(margin))

    per_row = pl.pallas_call(
        kernel,
        out_shape=jax.ShapeDtypeStruct((B, 1), jnp.float32),
        grid_spec=pltpu.PrefetchScalarGridSpec(
            num_scalar_prefetch=0,
            grid=(num_tiles,),
            in_specs=[
                pl.BlockSpec((tb, D), lambda i: (i, 0)),
                pl.BlockSpec((tb, D), lambda i: (i, 0)),
                pl.BlockSpec((tb, D), lambda i: (i, 0)),
            ],
            out_specs=pl.BlockSpec((tb, 1), lambda i: (i, 0)),
        ),
        compiler_params=pltpu.CompilerParams(
            dimension_semantics=("parallel",),
            vmem_limit_bytes=48 * 1024 * 1024,
        ),
    )(vac_emb, pos_emb, neg_emb)

    # Tiny final reduction in plain JAX.
    return jnp.mean(per_row[:, 0])


def _reference(vac, pos, neg, margin=1.0):
    # Matches kernel numerics: multiply in input dtype, accumulate in f32.
    pos_scores = jnp.sum((vac * pos).astype(jnp.float32), axis=1)
    neg_scores = jnp.sum((vac * neg).astype(jnp.float32), axis=1)
    loss_val = jnp.exp(neg_scores + margin) - pos_scores
    loss_val = jnp.maximum(loss_val, 1.0)
    return jnp.mean(jnp.log(loss_val))


if __name__ == "__main__":
    key = jax.random.PRNGKey(0)
    k1, k2, k3 = jax.random.split(key, 3)

    # Test 1: f32, default tiling -> 2 tiles (16 rows + partial 8-row block).
    B, D = 24, 32
    vac = jax.random.normal(k1, (B, D), dtype=jnp.float32)
    pos = jax.random.normal(k2, (B, D), dtype=jnp.float32)
    neg = jax.random.normal(k3, (B, D), dtype=jnp.float32)
    out1 = jax.block_until_ready(
        contrastive_cross_entropy(vac, pos, neg, "train", margin=1.0))
    ref1 = _reference(vac, pos, neg, margin=1.0)
    assert jnp.allclose(out1, ref1, atol=1e-5, rtol=1e-5), (out1, ref1)

    # Test 2: explicit small tile, 3-tile grid with ragged last block (no padding).
    B2 = 21
    out2 = jax.block_until_ready(
        contrastive_cross_entropy(vac[:B2], pos[:B2], neg[:B2], "train",
                                  margin=1.0, tb=8))
    ref2 = _reference(vac[:B2], pos[:B2], neg[:B2], margin=1.0)
    assert jnp.allclose(out2, ref2, atol=1e-5, rtol=1e-5), (out2, ref2)

    # Test 3: bf16 inputs (16-row aligned tiles, bf16 multiply + f32 accumulate).
    B3, D3 = 40, 128
    vb = jax.random.normal(k1, (B3, D3), dtype=jnp.float32).astype(jnp.bfloat16)
    pb = jax.random.normal(k2, (B3, D3), dtype=jnp.float32).astype(jnp.bfloat16)
    nb = jax.random.normal(k3, (B3, D3), dtype=jnp.float32).astype(jnp.bfloat16)
    out3 = jax.block_until_ready(
        contrastive_cross_entropy(vb, pb, nb, "train", margin=1.0))
    ref3 = _reference(vb, pb, nb, margin=1.0)
    assert jnp.allclose(out3, ref3, atol=1e-3, rtol=1e-3), (out3, ref3)

    print("KERNEL_OK")
</pallas_src>

<mosaic_0001>
module attributes {stable_mosaic.version = 11 : i64} {
  func.func @_cce_kernel(%arg0: i32, %arg1: memref<16x32xf32, #tpu.memory_space<vmem>>, %arg2: memref<16x32xf32, #tpu.memory_space<vmem>>, %arg3: memref<16x32xf32, #tpu.memory_space<vmem>>, %arg4: memref<16x1xf32, #tpu.memory_space<vmem>>) attributes {dimension_semantics = [#tpu.dimension_semantics<parallel>], iteration_bounds = array<i64: 2>, scalar_prefetch = 0 : i64, scratch_operands = 0 : i64, tpu.core_type = #tpu.core_type<tc>, window_params = [{transform_indices = @transform_0, window_bounds = array<i64: 16, 32>}, {transform_indices = @transform_1, window_bounds = array<i64: 16, 32>}, {transform_indices = @transform_2, window_bounds = array<i64: 16, 32>}, {transform_indices = @transform_3, window_bounds = array<i64: 16, 1>}]} {
    %c0 = arith.constant 0 : index
    %c0_0 = arith.constant 0 : index
    %0 = vector.load %arg1[%c0, %c0_0] : memref<16x32xf32, #tpu.memory_space<vmem>>, vector<16x32xf32>
    %c0_1 = arith.constant 0 : index
    %c0_2 = arith.constant 0 : index
    %1 = vector.load %arg2[%c0_1, %c0_2] : memref<16x32xf32, #tpu.memory_space<vmem>>, vector<16x32xf32>
    %c0_3 = arith.constant 0 : index
    %c0_4 = arith.constant 0 : index
    %2 = vector.load %arg3[%c0_3, %c0_4] : memref<16x32xf32, #tpu.memory_space<vmem>>, vector<16x32xf32>
    %3 = arith.mulf %0, %1 : vector<16x32xf32>
    %cst = arith.constant dense<0.000000e+00> : vector<16xf32>
    %4 = vector.multi_reduction <add>, %3, %cst [1] : vector<16x32xf32> to vector<16xf32>
    %5 = vector.shape_cast %4 : vector<16xf32> to vector<16x1xf32>
    %6 = arith.mulf %0, %2 : vector<16x32xf32>
    %cst_5 = arith.constant dense<0.000000e+00> : vector<16xf32>
    %7 = vector.multi_reduction <add>, %6, %cst_5 [1] : vector<16x32xf32> to vector<16xf32>
    %8 = vector.shape_cast %7 : vector<16xf32> to vector<16x1xf32>
    %cst_6 = arith.constant 1.000000e+00 : f32
    %9 = vector.broadcast %cst_6 : f32 to vector<16x1xf32>
    %10 = arith.addf %8, %9 : vector<16x1xf32>
    %11 = math.exp %10 : vector<16x1xf32>
    %12 = arith.subf %11, %5 : vector<16x1xf32>
    %cst_7 = arith.constant 1.000000e+00 : f32
    %13 = vector.broadcast %cst_7 : f32 to vector<16x1xf32>
    %14 = arith.maximumf %12, %13 : vector<16x1xf32>
    %15 = math.log %14 : vector<16x1xf32>
    %c0_8 = arith.constant 0 : index
    %c0_9 = arith.constant 0 : index
    %16 = vector.load %arg4[%c0_8, %c0_9] : memref<16x1xf32, #tpu.memory_space<vmem>>, vector<16x1xf32>
    tpu.vector_store %arg4[%c0_8, %c0_9], %15 {strides = array<i32>} : memref<16x1xf32, #tpu.memory_space<vmem>>, vector<16x1xf32>,
    return
  }
  func.func @transform_0(%arg0: i32) -> (i32, i32) {
    %c0_i32 = arith.constant 0 : i32
    %c0_i32_0 = arith.constant 0 : i32
    return %arg0, %c0_i32 : i32, i32
  }
  func.func @transform_1(%arg0: i32) -> (i32, i32) {
    %c0_i32 = arith.constant 0 : i32
    %c0_i32_0 = arith.constant 0 : i32
    return %arg0, %c0_i32 : i32, i32
  }
  func.func @transform_2(%arg0: i32) -> (i32, i32) {
    %c0_i32 = arith.constant 0 : i32
    %c0_i32_0 = arith.constant 0 : i32
    return %arg0, %c0_i32 : i32, i32
  }
  func.func @transform_3(%arg0: i32) -> (i32, i32) {
    %c0_i32 = arith.constant 0 : i32
    %c0_i32_0 = arith.constant 0 : i32
    return %arg0, %c0_i32 : i32, i32
  }
}

</mosaic_0001>

<bundles_post_ra>
// kernel: tpu_custom_call.1
= control target key start
LH: loop header
LB: loop body
LE: loop exit
PB: predicated region body
PF: predicated region fallthrough
CT: control target
= control target key end

     0   :  { %8 = vsyncpa [#allocation3], 0  ;;  %s1296_s0 = inlined_call_operand.hbm [shape: f32[24,32], index: 0, kind: input, shape index: {}]   ;;  %s1297_s1 = inlined_call_operand.hbm [shape: f32[24,32], index: 1, kind: input, shape index: {}]   ;;  %s1298_s2 = inlined_call_operand.hbm [shape: f32[24,32], index: 2, kind: input, shape index: {}]   ;;  %s1299_s3 = inlined_call_operand.vmem [shape: f32[24,1], index: 3, kind: output, shape index: {}]  }
   0x1   :  { %10 = vsyncpa [#allocation3 + $0x1], 0 }
   0x2   :  { %11 = vsyncpa [#allocation5], 0 }
   0x3   :  { %13 = vsyncpa [#allocation5 + $0x1], 0  ;;  %s1038_s12 = smov 0   ;;  %s1040_s13 = smov 0  }
   0x4   :  { %s1042_s14 = smov 0   ;;  %s1044_s15 = smov 0  }
   0x5 LB: > { %s1057_s16 = sadd.s32 4294967295, %s975_s15   ;;  %s1060_s17 = sadd.s32 1, %s975_s15   ;;  %s975_s15 = sphi %s1044_s15, %s1309_s15   ;;  %s971_s14 = sphi %s1042_s14, %s1308_s14   ;;  %s967_s13 = sphi %s1040_s13, %s1307_s13   ;;  %s963_s12 = sphi %s1038_s12, %s1306_s12  }
   0x6   : > { %s23_s18 = ssub.s32 %s975_s15, %s1060_s17  ;;  %s26_s19 = sadd.s32 1, %s971_s14 }
   0x7   : > { %p24_p0 = scmp.eq.s32.totalorder %s23_s18, 0  ;;  %p33_p1 = scmp.ne.s32.totalorder %s971_s14, %s967_s13 }
   0x8   : > { %p34_p2 = scmp.eq.s32.totalorder %s975_s15, 0  ;;  %p39_p3 = scmp.ne.s32.totalorder %s967_s13, %s963_s12 }
   0x9   : > { %s1070_s20 = scalar_select %p24_p0, %s971_s14, %s26_s19  }
   0xa   : > { %p1072_p4 = por %p34_p2, %p33_p1  ;;  %p40_p5 = scmp.eq.s32.totalorder %s1057_s16, 0 }
   0xb   : > { %p115_p6 = scmp.eq.s32.totalorder %s1057_s16, 1  ;;  %p625_p9 = scmp.ge.s32.totalorder %s975_s15, 2 }
   0xc   : > { %p1078_p7 = por %p40_p5, %p39_p3 }
   0xd   : > { %p1082_p8 = por %p115_p6, %p33_p1  ;;  %137 = sbr.rel (%p625_p9) target bundleno = 126 (0x7e), region = 16 }
  0x12   : > { %140 = sbr.rel (!%p1072_p4) target bundleno = 54 (0x36), region = 20  ;;  %s141_s24 = sand.u32 (%p1072_p4), 1, %s971_s14  }
  0x13   : > { %s627_s25 = sshll.u32 (%p1072_p4), %s975_s15, 1  ;;  %s626_s26 = sshll.u32 (%p1072_p4), %s141_s24, 4 }
  0x14   : > { %s147_s27 = ssub.s32 (%p1072_p4), 3, %s627_s25  ;;  %s1094_s4 = scalar_lea.sflag (%p1072_p4), [#allocation3], %s141_s24 }
  0x15   : > { %p148_p10 = scmp.lt.s32.totalorder (%p1072_p4), %s147_s27, 2  ;;  %s145_s5 = scalar_lea.vmem (%p1072_p4), [#allocation2], %s626_s26 }
  0x17   : > { %s1311_s27 = smov (!%p148_p10, %s147_s27), 2 }
  0x18   : > { %s628_s28 = sshll.u32 %s1311_s27, 3 }
  0x19   : > { %s151_s29 = ssub.s32 16, %s628_s28 }
  0x1a   : > { %s152_s30 = sshll.u32 %s151_s29, 4 }
  0x1b   : > { %153 = vsyncadd %s1094_s4, %s152_s30  ;;  %p1097_p11 = scmp.ne.s32.totalorder %s628_s28, 0  ;;  %s669_s7 = sshll.u32 %s975_s15, 4 }
  0x1c   : > { %s156_s10 = scalar_lea.hbm %s1296_s0, %s669_s7  ;;  %s1105_s11 = sshll.u32 %s145_s5, 4  ;;  %s161_s11 = int_to_ptr.vmem [resolvable:$true] %s1105_s11 }
  0x1d   : > { %s158_s12 = sshll.u32 %s156_s10, 4  ;;  %s632_s18 = sshll.u32 %s1311_s27, 7  ;;  %s1108_s12 = int_to_ptr.hbm [resolvable:$true] %s158_s12 }
  0x1e   : > { %s788_s19 = sshra.s32 %s1108_s12, 4  ;;  %s790_s24 = sshrl.u32 %s632_s18, 4  ;;  %s789_s19 = int_to_ptr.hbm [resolvable:$true] %s788_s19 }
  0x1f   : > { %s795_s25 = scalar_lea.hbm %s789_s19, %s790_s24  ;;  %s799_s29 = scalar_lea.hbm %s1296_s0, 24 }
  0x20   : > { %p796_p12 = scmp.ne.s32.totalorder %s789_s19, %s795_s25  ;;  %p800_p1 = scmp.lt.s32.totalorder %s789_s19, %s1296_s0 }
  0x21   : > { %p801_p2 = scmp.lt.s32.totalorder %s799_s29, %s795_s25 }
  0x22   : > { %p797_p13 = pnand %p796_p12, %p1097_p11 }
  0x23   : > { %p802_p3 = por %p801_p2, %p800_p1 }
  0x24   : > { %p798_p0 = pneg %p797_p13 }
  0x26   : > { %p803_p5 = pnand %p802_p3, %p798_p0 }
  0x28   : > { %806 = shalt.err (!%p803_p5)
}
  0x29   : > { %s807_s7 = sshra.s32 %s161_s11, 4  ;;  %s1009_s9 = smov [#allocation2]   ;;  %s808_s7 = int_to_ptr.vmem [resolvable:$true] %s807_s7 }
  0x2a   : > { %s814_s8 = scalar_lea.vmem %s808_s7, %s790_s24  ;;  %s818_s10 = scalar_lea.vmem %s1009_s9, 32 }
  0x2b   : > { %p815_p6 = scmp.ne.s32.totalorder %s808_s7, %s814_s8  ;;  %p820_p12 = scmp.lt.s32.totalorder %s818_s10, %s814_s8 }
  0x2d   : > { %p816_p9 = pnand %p815_p6, %p1097_p11 }
  0x2f   : > { %p817_p10 = pneg %p816_p9 }
  0x31   : > { %p822_p13 = pnand %p820_p12, %p817_p10 }
  0x33   : > { %825 = shalt.err (!%p822_p13)
}
  0x34   : > { %s1010_s19 = smov 128   ;;  %s1011_s25 = smov 8  }
  0x35   : > { %166 = dma.hbm_to_vmem [thread:$0]  (%p1097_p11), %s1108_s12, %s632_s18, %s161_s11, %s1094_s4, %s1010_s19, %s1010_s19, %s1011_s25  }
  0x36 PF: > { %169 = sbr.rel (!%p1072_p4) target bundleno = 90 (0x5a), region = 24  ;;  %s170_s24 = sand.u32 (%p1072_p4), 1, %s975_s15  }
  0x37   : > { %s172_s26 = sand.u32 (%p1072_p4), 1, %s971_s14   ;;  %s634_s29 = sshll.u32 (%p1072_p4), %s975_s15, 1 }
  0x38   : > { %s633_s28 = sshll.u32 (%p1072_p4), %s172_s26, 4  ;;  %s176_s30 = ssub.s32 (%p1072_p4), 3, %s634_s29 }
  0x39   : > { %p177_p0 = scmp.lt.s32.totalorder (%p1072_p4), %s176_s30, 2  ;;  %s1142_s4 = scalar_lea.sflag (%p1072_p4), [#allocation5], %s170_s24 }
  0x3a   : > { %s174_s11 = scalar_lea.vmem (%p1072_p4), [#allocation4], %s633_s28 }
  0x3b   : > { %s1313_s30 = smov (!%p177_p0, %s176_s30), 2 }
  0x3c   : > { %s635_s6 = sshll.u32 %s1313_s30, 3 }
  0x3d   : > { %s180_s5 = ssub.s32 16, %s635_s6 }
  0x3e   : > { %s181_s27 = sshll.u32 %s180_s5, 4 }
  0x3f   : > { %182 = vsyncadd %s1142_s4, %s181_s27  ;;  %p1145_p11 = scmp.ne.s32.totalorder %s635_s6, 0  ;;  %s670_s18 = sshll.u32 %s975_s15, 4 }
  0x40   : > { %s185_s9 = scalar_lea.hbm %s1297_s1, %s670_s18  ;;  %s1153_s10 = sshll.u32 %s174_s11, 4  ;;  %s190_s10 = int_to_ptr.vmem [resolvable:$true] %s1153_s10 }
  0x41   : > { %s187_s19 = sshll.u32 %s185_s9, 4  ;;  %s639_s25 = sshll.u32 %s1313_s30, 7  ;;  %s1156_s19 = int_to_ptr.hbm [resolvable:$true] %s187_s19 }
  0x42   : > { %s827_s24 = sshra.s32 %s1156_s19, 4  ;;  %s829_s26 = sshrl.u32 %s639_s25, 4  ;;  %s828_s24 = int_to_ptr.hbm [resolvable:$true] %s827_s24 }
  0x43   : > { %s834_s28 = scalar_lea.hbm %s828_s24, %s829_s26  ;;  %s838_s5 = scalar_lea.hbm %s1297_s1, 24 }
  0x44   : > { %p835_p1 = scmp.ne.s32.totalorder %s828_s24, %s834_s28  ;;  %p839_p5 = scmp.lt.s32.totalorder %s828_s24, %s1297_s1 }
  0x45   : > { %p840_p6 = scmp.lt.s32.totalorder %s838_s5, %s834_s28 }
  0x46   : > { %p836_p2 = pnand %p835_p1, %p1145_p11 }
  0x47   : > { %p841_p9 = por %p840_p6, %p839_p5 }
  0x48   : > { %p837_p3 = pneg %p836_p2 }
  0x4a   : > { %p842_p10 = pnand %p841_p9, %p837_p3 }
  0x4c   : > { %845 = shalt.err (!%p842_p10)
}
  0x4d   : > { %s846_s18 = sshra.s32 %s190_s10, 4  ;;  %s1012_s8 = smov [#allocation4]   ;;  %s847_s18 = int_to_ptr.vmem [resolvable:$true] %s846_s18 }
  0x4e   : > { %s853_s7 = scalar_lea.vmem %s847_s18, %s829_s26  ;;  %s857_s9 = scalar_lea.vmem %s1012_s8, 32 }
  0x4f   : > { %p854_p12 = scmp.ne.s32.totalorder %s847_s18, %s853_s7  ;;  %p859_p1 = scmp.lt.s32.totalorder %s857_s9, %s853_s7 }
  0x51   : > { %p855_p13 = pnand %p854_p12, %p1145_p11 }
  0x53   : > { %p856_p0 = pneg %p855_p13 }
  0x55   : > { %p861_p2 = pnand %p859_p1, %p856_p0 }
  0x57   : > { %864 = shalt.err (!%p861_p2)
}
  0x58   : > { %s1013_s24 = smov 128   ;;  %s1014_s28 = smov 8  }
  0x59   : > { %195 = dma.hbm_to_vmem [thread:$0]  (%p1145_p11), %s1156_s19, %s639_s25, %s190_s10, %s1142_s4, %s1013_s24, %s1013_s24, %s1014_s28  }
  0x5a PF: > { %198 = sbr.rel (!%p1072_p4) target bundleno = 126 (0x7e), region = 28  ;;  %s199_s26 = sand.u32 (%p1072_p4), 1, %s975_s15  }
  0x5b   : > { %s201_s29 = sand.u32 (%p1072_p4), 1, %s971_s14   ;;  %s641_s5 = sshll.u32 (%p1072_p4), %s975_s15, 1 }
  0x5c   : > { %s640_s6 = sshll.u32 (%p1072_p4), %s201_s29, 4  ;;  %s205_s27 = ssub.s32 (%p1072_p4), 3, %s641_s5 }
  0x5d   : > { %p206_p3 = scmp.lt.s32.totalorder (%p1072_p4), %s205_s27, 2  ;;  %s1190_s4 = scalar_lea.sflag (%p1072_p4), [#allocation5], %s199_s26 }
  0x5e   : > { %s203_s21 = scalar_lea.vmem (%p1072_p4), [#allocation6], %s640_s6 }
  0x5f   : > { %s1315_s27 = smov (!%p206_p3, %s205_s27), 2 }
  0x60   : > { %s642_s12 = sshll.u32 %s1315_s27, 3 }
  0x61   : > { %s209_s11 = ssub.s32 16, %s642_s12 }
  0x62   : > { %s210_s30 = sshll.u32 %s209_s11, 4 }
  0x63   : > { %211 = vsyncadd %s1190_s4, %s210_s30  ;;  %p1193_p4 = scmp.ne.s32.totalorder %s642_s12, 0  ;;  %s671_s19 = sshll.u32 %s975_s15, 4 }
  0x64   : > { %s214_s7 = scalar_lea.hbm %s1298_s2, %s671_s19  ;;  %s1201_s8 = sshll.u32 %s203_s21, 4  ;;  %s219_s8 = int_to_ptr.vmem [resolvable:$true] %s1201_s8 }
  0x65   : > { %s216_s9 = sshll.u32 %s214_s7, 4  ;;  %s646_s24 = sshll.u32 %s1315_s27, 7  ;;  %s1204_s9 = int_to_ptr.hbm [resolvable:$true] %s216_s9 }
  0x66   : > { %s866_s28 = sshra.s32 %s1204_s9, 4  ;;  %s868_s26 = sshrl.u32 %s646_s24, 4  ;;  %s867_s28 = int_to_ptr.hbm [resolvable:$true] %s866_s28 }
  0x67   : > { %s873_s29 = scalar_lea.hbm %s867_s28, %s868_s26  ;;  %s877_s12 = scalar_lea.hbm %s1298_s2, 24 }
  0x68   : > { %p874_p11 = scmp.ne.s32.totalorder %s867_s28, %s873_s29  ;;  %p878_p9 = scmp.lt.s32.totalorder %s867_s28, %s1298_s2 }
  0x69   : > { %p879_p10 = scmp.lt.s32.totalorder %s877_s12, %s873_s29 }
  0x6a   : > { %p875_p5 = pnand %p874_p11, %p1193_p4 }
  0x6b   : > { %p880_p12 = por %p879_p10, %p878_p9 }
  0x6c   : > { %p876_p6 = pneg %p875_p5 }
  0x6e   : > { %p881_p13 = pnand %p880_p12, %p876_p6 }
  0x70   : > { %884 = shalt.err (!%p881_p13)
}
  0x71   : > { %s885_s21 = sshra.s32 %s219_s8, 4  ;;  %s1015_s25 = smov [#allocation6]   ;;  %s886_s21 = int_to_ptr.vmem [resolvable:$true] %s885_s21 }
  0x72   : > { %s892_s19 = scalar_lea.vmem %s886_s21, %s868_s26  ;;  %s896_s18 = scalar_lea.vmem %s1015_s25, 32 }
  0x73   : > { %p893_p0 = scmp.ne.s32.totalorder %s886_s21, %s892_s19  ;;  %p898_p3 = scmp.lt.s32.totalorder %s896_s18, %s892_s19 }
  0x75   : > { %p894_p1 = pnand %p893_p0, %p1193_p4 }
  0x77   : > { %p895_p2 = pneg %p894_p1 }
  0x79   : > { %p900_p11 = pnand %p898_p3, %p895_p2 }
  0x7b   : > { %903 = shalt.err (!%p900_p11)
}
  0x7c   : > { %s1016_s7 = smov 128   ;;  %s1017_s28 = smov 8  }
  0x7d   : > { %224 = dma.hbm_to_vmem [thread:$0]  (%p1193_p4), %s1204_s9, %s646_s24, %s219_s8, %s1190_s4, %s1016_s7, %s1016_s7, %s1017_s28  }
  0x7e PF: > { %p647_p5 = scmp.ge.s32.totalorder %s975_s15, 1  ;;  %p226_p6 = scmp.lt.s32.totalorder %s975_s15, 3 }
  0x80   : > { %p227_p9 = pnand %p647_p5, %p226_p6 }
  0x81   : > { %s232_s26 = sand.u32 (!%p227_p9), 1, %s967_s13  }
  0x82   : > { %230 = sbr.rel (%p227_p9) target bundleno = 332 (0x14c), region = 32  ;;  %s1233_s29 = sshll.u32 (!%p227_p9), %s232_s26, 4 }
  0x83   : > { %s233_s6 = scalar_lea.sflag (!%p227_p9), [#allocation3], %s232_s26  ;;  %s236_s5 = scalar_lea.vmem (!%p227_p9), [#allocation2], %s1233_s29 }
  0x87   : > { %954 = dma.done.wait (%p1078_p7), %s233_s6, 256  }
  0x88   : > { %956 = vsyncadd (%p1078_p7), %s233_s6, 4294967040  ;;  %s242_s27 = sand.u32 1, %s1057_s16   ;;  %s246_s4 = scalar_lea.vmem [#allocation4], %s1233_s29 }
  0x89   : > { %s243_s15 = scalar_lea.sflag [#allocation5], %s242_s27 }
  0x8a   : > { %958 = dma.done.wait (%p1078_p7), %s243_s15, 512  }
  0x8b   : > { %960 = vsyncadd (%p1078_p7), %s243_s15, 4294966784  ;;  %v309_v0 = vld [vmem:[%s236_s5] sm:$0xff]  ;;  %s256_s10 = scalar_lea.vmem [#allocation6], %s1233_s29  ;;  %vm317_vm0 = vcmask 261120   ;;  %v310_v4 = vld [vmem:[%s236_s5 + $0x8] sm:$0xff]  ;;  %vm346_vm1 = vcmask 7168  }
  0x8c   : > { %v313_v1 = vld [vmem:[%s256_s10] sm:$0xff]  ;;  %v314_v5 = vld [vmem:[%s256_s10 + $0x8] sm:$0xff]  ;;  %s1248_s22 = scalar_lea.vmem [#allocation7], %s1233_s29   ;;  %s653_s8 = sshll.u32 (%p1082_p8), %s1057_s16, 1 }
  0x8d   : > { %v324_v2 = vmul.f32 %v313_v1, %v309_v0  ;;  %v311_v3 = vld [vmem:[%s246_s4] sm:$0xff]  ;;  %v312_v8 = vld [vmem:[%s246_s4 + $0x8] sm:$0xff]  ;;  %v325_v10 = vmul.f32 %v314_v5, %v310_v4  ;;  %s672_s9 = sshll.u32 (%p1082_p8), %s1057_s16, 4  ;;  %s357_s24 = ssub.s32 (%p1082_p8), 3, %s653_s8 }
  0x8e   : > { %v315_v6 = vmul.f32 %v311_v3, %v309_v0  ;;  %v316_v11 = vmul.f32 %v312_v8, %v310_v4  ;;  %s1259_s30 = scalar_lea.vmem (%p1082_p8), %s1299_s3, %s672_s9   ;;  %p358_p7 = scmp.lt.s32.totalorder (%p1082_p8), %s357_s24, 2 }
  0x8f   : > { %v326_v7 = vsel %vm317_vm0, %v324_v2, 0.0  ;;  %v329_v12 = vsel %vm317_vm0, %v325_v10, 0.0 }
  0x90   : > { %327 = vadd.xlane.f32.xlu0 %v326_v7  ;;  %v318_v9 = vsel %vm317_vm0, %v315_v6, 0.0  ;;  %v321_v13 = vsel %vm317_vm0, %v316_v11, 0.0 }
  0x91   : > { %319 = vadd.xlane.f32.xlu1 %v318_v9 }
  0x98   : > { %330 = vadd.xlane.f32.xlu0 %v329_v12 }
  0x99   : > { %322 = vadd.xlane.f32.xlu1 %v321_v13 }
 0x103   : > { %v328_v14 = vpop.xlane.xlu0 %327 }
 0x104   : > { %v332_v15 = vadd.f32 1.0, %v328_v14  ;;  %v320_v17 = vpop.xlane.xlu1 %319 }
 0x106   : > { %v334_v16 = vmul.f32 1.442695, %v332_v15 }
 0x108   : > { %780 = vpow2.f32 %v334_v16 }
 0x10b   : > { %v331_v18 = vpop.xlane.xlu0 %330 }
 0x10c   : > { %v333_v19 = vadd.f32 1.0, %v331_v18  ;;  %v323_v24 = vpop.xlane.xlu1 %322 }
 0x10e   : > { %v781_v20 = vpop.eup %780  ;;  %v336_v21 = vmul.f32 1.442695, %v333_v19 }
 0x10f   : > { %v338_v22 = vsub.f32 %v781_v20, %v320_v17 }
 0x110   : > { %782 = vpow2.f32 %v336_v21 }
 0x111   : > { %v340_v23 = vmax.f32 %v338_v22, 1.0 }
 0x113   : > { %784 = vlog2.f32 %v340_v23 }
 0x116   : > { %v783_v25 = vpop.eup %782 }
 0x117   : > { %v339_v26 = vsub.f32 %v783_v25, %v323_v24 }
 0x119   : > { %v785_v27 = vpop.eup %784  ;;  %v341_v28 = vmax.f32 %v339_v26, 1.0 }
 0x11a   : > { %v343_v29 = vmul.f32 0.6931472, %v785_v27 }
 0x11b   : > { %786 = vlog2.f32 %v341_v28 }
 0x11c   : > { %347 = vst.msk [vmem:[%s1248_s22] sm:$0xff] %vm346_vm1, %v343_v29 }
 0x120   : > { %355 = sbr.rel (!%p1082_p8) target bundleno = 332 (0x14c), region = 48 }
 0x121   : > { %v787_v30 = vpop.eup %786 }
 0x122   : > { %v345_v31 = vmul.f32 0.6931472, %v787_v30 }
 0x124   : > { %348 = vst.msk [vmem:[%s1248_s22 + $0x8] sm:$0xff] %vm346_vm1, %v345_v31 }
 0x125   : > { %s1317_s24 = smov (!%p358_p7, %s357_s24), 2 }
 0x126   : > { %s654_s21 = sshll.u32 %s1317_s24, 3 }
 0x127   : > { %p657_p4 = scmp.eq.s32.totalorder %s654_s21, 0 }
 0x128   : > { %s1265_s23 = sshrl.u32 (!%p657_p4), %s1317_s24, 1 }
 0x129   : > { %366 = sbr.rel (%p657_p4) target bundleno = 332 (0x14c), region = 52  ;;  %p658_p8 = scmp.le.s32.totalorder (!%p657_p4), %s1265_s23, 0 }
 0x12e   : > { %558 = sbr.rel (%p658_p8) target bundleno = 315 (0x13b), region = 150  ;;  %s977_s16 = smov (!%p658_p8), %s1259_s30  }
 0x12f   : > { %s981_s19 = smov (!%p658_p8), %s1248_s22   ;;  %s985_s25 = smov (!%p658_p8), 0  }
 0x130   : > { %s989_s18 = smov (!%p658_p8), 0  }
 0x133 LB: >> { %v431_v32 = vld [vmem:[%s983_s19] sm:$0xff]  ;;  %v433_v33 = vld [vmem:[%s983_s19 + $0x8] sm:$0xff]  ;;  %s435_s7 = sadd.s32 1, %s987_s25  ;;  %s425_s18 = sadd.s32 1, %s991_s18   ;;  %s991_s18 = sphi %s989_s18, %s425_s18   ;;  %s987_s25 = sphi %s985_s25, %s986_s25   ;;  %s983_s19 = sphi %s981_s19, %s440_s19   ;;  %s979_s16 = sphi %s977_s16, %s441_s16  }
 0x134   : >> { %432 = vst [vmem:[%s979_s16] sm:$0xff] %v431_v32  ;;  %p436_p10 = scmp.ge.s32.totalorder %s435_s7, %s1265_s23  ;;  %p424_p12 = scmp.ge.s32.totalorder %s425_s18, %s1265_s23 }
 0x135   : >> { %434 = vst [vmem:[%s979_s16 + $0x8] sm:$0xff] %v433_v33 }
 0x136   : >> { %s1319_s7 = smov (%p436_p10, %s435_s7), 0  ;;  %427 = sbr.rel (!%p424_p12) target bundleno = 307 (0x133), region = 156 }
 0x137   : >> { %s659_s28 = sshll.u32 %s1319_s7, 4  ;;  %s986_s25 = smov %s1319_s7  }
 0x138   : >> { %s440_s19 = scalar_lea.vmem %s1248_s22, %s659_s28 [#allocation7]   ;;  %s441_s16 = scalar_lea.vmem %s1259_s30, %s659_s28  }
 0x13b PF: > { %s1275_s26 = sand.u32 1, %s1317_s24   ;;  %s673_s29 = sshll.u32 %s1265_s23, 4 }
 0x13c   : > { %s446_s6 = scalar_lea.vmem %s1248_s22, %s673_s29 [#allocation7]   ;;  %s448_s5 = scalar_lea.vmem %s1259_s30, %s673_s29  }
 0x13d   : > { %p664_p13 = scmp.le.s32.totalorder %s1275_s26, 0 }
 0x13e   : > { %s993_s27 = smov (!%p664_p13), %s448_s5   ;;  %s997_s15 = smov (!%p664_p13), %s446_s6  }
 0x13f   : > { %572 = sbr.rel (%p664_p13) target bundleno = 332 (0x14c), region = 161  ;;  %s1001_s4 = smov (!%p664_p13), 0  }
 0x140   : > { %s1005_s10 = smov (!%p664_p13), 0  }
 0x144 LB: >> { %v458_v34 = vld [vmem:[%s999_s15] sm:$0xff]  ;;  %s460_s8 = sadd.s32 1, %s1003_s4  ;;  %s452_s10 = sadd.s32 1, %s1007_s10   ;;  %s1007_s10 = sphi %s1005_s10, %s452_s10   ;;  %s1003_s4 = sphi %s1001_s4, %s1002_s4   ;;  %s999_s15 = sphi %s997_s15, %s465_s15   ;;  %s995_s27 = sphi %s993_s27, %s466_s27  }
 0x145   : >> { %459 = vst [vmem:[%s995_s27] sm:$0xff] %v458_v34  ;;  %p461_p0 = scmp.ge.s32.totalorder %s460_s8, %s1275_s26  ;;  %p451_p1 = scmp.ge.s32.totalorder %s452_s10, %s1275_s26 }
 0x147   : >> { %s1321_s8 = smov (%p461_p0, %s460_s8), 0  ;;  %454 = sbr.rel (!%p451_p1) target bundleno = 324 (0x144), region = 167 }
 0x148   : >> { %s665_s22 = sshll.u32 %s1321_s8, 3  ;;  %s1002_s4 = smov %s1321_s8  }
 0x149   : >> { %s465_s15 = scalar_lea.vmem %s446_s6, %s665_s22 [#allocation7]   ;;  %s466_s27 = scalar_lea.vmem %s448_s5, %s665_s22  }
 0x14c PF: > { %p16_p2 = scmp.ge.s32.totalorder %s1060_s17, 4   ;;  %s1306_s12 = smov %s967_s13 }
 0x14d   : > { %s1307_s13 = smov %s971_s14  ;;  %s1308_s14 = smov %s1070_s20 }
 0x14e   : > { %s1309_s15 = smov %s1060_s17  ;;  %18 = sbr.rel (!%p16_p2) target bundleno = 5 (0x5), region = 178 }
 0x153   :  { %482 = vsyncpa [#allocation3], 1 }
 0x154   :  { %484 = vsyncpa [#allocation3 + $0x1], 1 }
 0x155   :  { %485 = vsyncpa [#allocation5], 1 }
 0x156   :  { %487 = vsyncpa [#allocation5 + $0x1], 1 }

</bundles_post_ra>
